<compile_context>
chip_gen: v7x
topology: tpu7x:2x2x1
jax: 0.10.0
libtpu: 0.0.40
codegen_flags: <defaults>
</compile_context>

<pallas_src>
import numpy as np
import jax
import jax.numpy as jnp
from jax.experimental import pallas as pl
from jax.experimental.pallas import tpu as pltpu

LANE = 128
MAX_TILE_B = 1024   # sweep 1024-2048; at 1024 double-buffered x/out is ~1 MiB,
                    # far inside v7x's 64 MiB VMEM even with resident weights.


# ----------------------------------------------------------------------------
# Mask construction (numpy, identical math to the PyTorch reference, seeded)
# ----------------------------------------------------------------------------
def sample_mask_indices(D, H, rng, simple=False):
    if simple:
        return rng.randint(0, D, size=(H,))
    mk = np.linspace(0, D - 1, H)
    ints = np.array(mk, dtype=int)
    ints += rng.rand() < mk - ints
    return ints


def create_mask(D_observed, D_latent, H, num_layers, seed=0):
    rng = np.random.RandomState(seed)
    m_input = np.concatenate((np.zeros(D_observed), 1 + np.arange(D_latent)))
    m_w = [sample_mask_indices(D_latent, H, rng) for _ in range(num_layers)]
    m_v = np.arange(D_latent)
    M_A = 1.0 * (np.atleast_2d(m_v).T >= np.atleast_2d(m_input))
    M_W = [1.0 * (np.atleast_2d(m_w[0]).T >= np.atleast_2d(m_input))]
    for i in range(1, num_layers):
        M_W.append(1.0 * (np.atleast_2d(m_w[i]).T >= np.atleast_2d(m_w[i - 1])))
    M_V = 1.0 * (np.atleast_2d(m_v).T >= np.atleast_2d(m_w[-1]))
    return M_W, M_V, M_A


# ----------------------------------------------------------------------------
# Pallas kernel: masked-MLP hot path (pre-masked weights, no in-kernel concat)
# ----------------------------------------------------------------------------
def made_kernel(x_ref, w0_ref, b0_ref, w1_ref, b1_ref, v_ref, a_ref, c_ref, o_ref):
    x = x_ref[...]                                                   # [TB, D_in]

    # hidden layer 0: [TB, D_in] @ [D_in, H_p]   (f32 accumulation on MXU)
    h = jnp.dot(x, w0_ref[...], preferred_element_type=jnp.float32) + b0_ref[...]
    h = jnp.maximum(h, 0.0).astype(x.dtype)       # cast keeps bf16 MXU path hot

    # hidden layer 1: [TB, H_p] @ [H_p, H_p]
    h = jnp.dot(h, w1_ref[...], preferred_element_type=jnp.float32) + b1_ref[...]
    h = jnp.maximum(h, 0.0).astype(x.dtype)

    # output + masked skip connection as two accumulating MXU dots
    # (no concat buffer; identical FLOPs, zero extra vector-store traffic).
    out = jnp.dot(h, v_ref[...], preferred_element_type=jnp.float32)
    out = out + jnp.dot(x, a_ref[...], preferred_element_type=jnp.float32)
    o_ref[...] = (out + c_ref[...]).astype(o_ref.dtype)


# ----------------------------------------------------------------------------
# Wrapper helpers
# ----------------------------------------------------------------------------
def _round_up(n, m):
    return ((n + m - 1) // m) * m


def _pad2(a, rows, cols):
    return jnp.pad(a, ((0, rows - a.shape[0]), (0, cols - a.shape[1])))


def prepare_made_params(params, masks, use_bf16=False):
    """Apply the (static) masks, pad, fuse and optionally cast weights ONCE.

    Call once per parameter set and reuse across forwards, so the per-call
    path is a single pallas_call that only streams x (no per-call full-weight
    multiply/pad/concat passes through HBM)."""
    D_in, H = params["W0"].shape
    D_out = params["V"].shape[1]
    H_p = _round_up(H, LANE)          # NOTE: use multiples of 256 on v6e/v7x when MXU-bound
    D_out_p = _round_up(D_out, LANE)  # keep OUTPUT lane-dense -> unmasked vst
    wdt = jnp.bfloat16 if use_bf16 else jnp.float32
    return {
        "W0": _pad2(params["W0"] * masks["M0"], D_in, H_p).astype(wdt),
        "b0": _pad2(params["b0"], 1, H_p).astype(jnp.float32),
        "W1": _pad2(params["W1"] * masks["M1"], H_p, H_p).astype(wdt),
        "b1": _pad2(params["b1"], 1, H_p).astype(jnp.float32),
        "V":  _pad2(params["V"] * masks["MV"], H_p, D_out_p).astype(wdt),
        "A":  _pad2(params["A"] * masks["MA"], D_in, D_out_p).astype(wdt),
        "c":  _pad2(params["c"], 1, D_out_p).astype(jnp.float32),
        "D_in": D_in, "D_out": D_out, "H_p": H_p, "D_out_p": D_out_p,
        "x_dtype": wdt,
    }


def made_forward(x, prep):
    """x: [B, D_in] float32.  Returns [B, D_latent] float32."""
    B, D_in = x.shape
    assert D_in == prep["D_in"]
    H_p, D_out_p = prep["H_p"], prep["D_out_p"]

    # Batch tiling: pick the number of tiles first, then the smallest 8-row
    # tile that covers B -> no near-full wasted tile when B is just past a
    # MAX_TILE_B boundary (e.g. B=1025 -> 2x520 instead of 2x1024).
    B8 = _round_up(B, 8)
    n_tiles = pl.cdiv(B8, MAX_TILE_B)
    TILE_B = _round_up(pl.cdiv(B8, n_tiles), 8)
    B_pad = n_tiles * TILE_B

    # x keeps its TRUE last dim (full-array-dim block is always legal): avoids
    # a ~16x inflation of streamed HBM bytes when D_in << 128.
    x_p = x.astype(prep["x_dtype"])
    if B_pad != B:
        x_p = jnp.pad(x_p, ((0, B_pad - B), (0, 0)))

    def run(single_buffer_weights):
        if single_buffer_weights:
            # Constant index_map -> one buffer is enough; frees VMEM headroom
            # (required on v7x's 64 MiB VMEM once H gets large).
            res = lambda shape: pl.BlockSpec(shape, lambda i: (0, 0),
                                             pipeline_mode=pl.Buffered(1))
        else:
            res = lambda shape: pl.BlockSpec(shape, lambda i: (0, 0))
        return pl.pallas_call(
            made_kernel,
            out_shape=jax.ShapeDtypeStruct((B_pad, D_out_p), jnp.float32),
            grid=(n_tiles,),
            in_specs=[
                pl.BlockSpec((TILE_B, D_in), lambda i: (i, 0)),  # x (streamed)
                res((D_in, H_p)),        # W0*M0   (resident)
                res((1, H_p)),           # b0
                res((H_p, H_p)),         # W1*M1
                res((1, H_p)),           # b1
                res((H_p, D_out_p)),     # V*MV
                res((D_in, D_out_p)),    # A*MA  (skip connection)
                res((1, D_out_p)),       # c
            ],
            out_specs=pl.BlockSpec((TILE_B, D_out_p), lambda i: (i, 0)),
            compiler_params=pltpu.CompilerParams(
                # batch axis is independent -> shard across v7x's 2 TensorCores
                dimension_semantics=("parallel",),
                vmem_limit_bytes=32 * 1024 * 1024,
            ),
        )(x_p, prep["W0"], prep["b0"], prep["W1"], prep["b1"],
          prep["V"], prep["A"], prep["c"])

    try:
        out = run(True)
    except Exception:
        # Fallback for jax versions without pipeline_mode on pallas_call specs.
        out = run(False)

    return out[:B, :prep["D_out"]]


# ----------------------------------------------------------------------------
# Pure-JAX reference for a sanity check
# ----------------------------------------------------------------------------
def made_forward_ref(x, params, masks):
    h = jnp.maximum(x @ (params["W0"] * masks["M0"]) + params["b0"], 0.0)
    h = jnp.maximum(h @ (params["W1"] * masks["M1"]) + params["b1"], 0.0)
    return (h @ (params["V"] * masks["MV"])
            + x @ (params["A"] * masks["MA"]) + params["c"])


if __name__ == "__main__":
    # Small shapes consistent with the module's __init__.
    D_observed, D_latent, H, num_layers = 4, 4, 32, 2
    D_in = D_observed + D_latent
    B = 2

    # Masks (deterministic, seeded numpy RNG).
    M_W, M_V, M_A = create_mask(D_observed, D_latent, H, num_layers, seed=0)
    masks = {
        # transpose to [in_features, out_features] to match pre-transposed weights
        "M0": jnp.asarray(M_W[0].T, dtype=jnp.float32),   # [D_in, H]
        "M1": jnp.asarray(M_W[1].T, dtype=jnp.float32),   # [H, H]
        "MV": jnp.asarray(M_V.T, dtype=jnp.float32),      # [H, D_latent]
        "MA": jnp.asarray(M_A.T, dtype=jnp.float32),      # [D_in, D_latent]
    }

    # Deterministic parameter init (synthetic — no checkpoint).
    key = jax.random.PRNGKey(0)
    k = jax.random.split(key, 8)
    params = {
        "W0": jax.random.normal(k[0], (D_in, H), jnp.float32) * 0.1,
        "b0": jax.random.normal(k[1], (1, H), jnp.float32) * 0.01,
        "W1": jax.random.normal(k[2], (H, H), jnp.float32) * 0.1,
        "b1": jax.random.normal(k[3], (1, H), jnp.float32) * 0.01,
        "V":  jax.random.normal(k[4], (H, D_latent), jnp.float32) * 0.1,
        "c":  jax.random.normal(k[5], (1, D_latent), jnp.float32) * 0.01,
        "A":  jax.random.normal(k[6], (D_in, D_latent), jnp.float32) * 0.1,
    }

    x = jax.random.normal(k[7], (B, D_in), jnp.float32)
    ref = made_forward_ref(x, params, masks)

    # f32 path: exact parity with the reference.
    prep_f32 = prepare_made_params(params, masks, use_bf16=False)
    out = jax.block_until_ready(made_forward(x, prep_f32))
    np.testing.assert_allclose(np.asarray(out), np.asarray(ref), rtol=1e-5, atol=1e-5)

    # bf16 MXU fast path (v6e/v7x): masks are 0/1 so the autoregressive
    # structure is exact; only weight/activation values round -> loose tolerance.
    prep_bf16 = prepare_made_params(params, masks, use_bf16=True)
    out_bf16 = jax.block_until_ready(made_forward(x, prep_bf16))
    np.testing.assert_allclose(np.asarray(out_bf16), np.asarray(ref),
                               rtol=5e-2, atol=5e-2)

    print("KERNEL_OK")
</pallas_src>

<mosaic_0001>
module attributes {stable_mosaic.version = 11 : i64} {
  func.func @made_kernel(%arg0: i32, %arg1: memref<8x8xf32, #tpu.memory_space<vmem>>, %arg2: memref<8x128xf32, #tpu.memory_space<vmem>>, %arg3: memref<1x128xf32, #tpu.memory_space<vmem>>, %arg4: memref<128x128xf32, #tpu.memory_space<vmem>>, %arg5: memref<1x128xf32, #tpu.memory_space<vmem>>, %arg6: memref<128x128xf32, #tpu.memory_space<vmem>>, %arg7: memref<8x128xf32, #tpu.memory_space<vmem>>, %arg8: memref<1x128xf32, #tpu.memory_space<vmem>>, %arg9: memref<8x128xf32, #tpu.memory_space<vmem>>) attributes {dimension_semantics = [#tpu.dimension_semantics<parallel>], iteration_bounds = array<i64: 1>, scalar_prefetch = 0 : i64, scratch_operands = 0 : i64, tpu.core_type = #tpu.core_type<tc>, window_params = [{transform_indices = @transform_0, window_bounds = array<i64: 8, 8>}, {pipeline_mode = #tpu.pipeline_mode<synchronous>, transform_indices = @transform_1, window_bounds = array<i64: 8, 128>}, {pipeline_mode = #tpu.pipeline_mode<synchronous>, transform_indices = @transform_2, window_bounds = array<i64: 1, 128>}, {pipeline_mode = #tpu.pipeline_mode<synchronous>, transform_indices = @transform_3, window_bounds = array<i64: 128, 128>}, {pipeline_mode = #tpu.pipeline_mode<synchronous>, transform_indices = @transform_4, window_bounds = array<i64: 1, 128>}, {pipeline_mode = #tpu.pipeline_mode<synchronous>, transform_indices = @transform_5, window_bounds = array<i64: 128, 128>}, {pipeline_mode = #tpu.pipeline_mode<synchronous>, transform_indices = @transform_6, window_bounds = array<i64: 8, 128>}, {pipeline_mode = #tpu.pipeline_mode<synchronous>, transform_indices = @transform_7, window_bounds = array<i64: 1, 128>}, {transform_indices = @transform_8, window_bounds = array<i64: 8, 128>}]} {
    %c0 = arith.constant 0 : index
    %c0_0 = arith.constant 0 : index
    %0 = vector.load %arg1[%c0, %c0_0] : memref<8x8xf32, #tpu.memory_space<vmem>>, vector<8x8xf32>
    %c0_1 = arith.constant 0 : index
    %c0_2 = arith.constant 0 : index
    %1 = vector.load %arg2[%c0_1, %c0_2] : memref<8x128xf32, #tpu.memory_space<vmem>>, vector<8x128xf32>
    %cst = arith.constant dense<0.000000e+00> : vector<8x128xf32>
    %2 = tpu.matmul %0, %1, %cst {dimension_numbers = #tpu.dot_dimension_numbers<[1], [0], [0], [1], [0, 0, 1, 1], [], []>} : vector<8x8xf32>, vector<8x128xf32>, vector<8x128xf32> -> vector<8x128xf32>
    %c0_3 = arith.constant 0 : index
    %c0_4 = arith.constant 0 : index
    %3 = vector.load %arg3[%c0_3, %c0_4] : memref<1x128xf32, #tpu.memory_space<vmem>>, vector<1x128xf32>
    %4 = vector.broadcast %3 : vector<1x128xf32> to vector<8x128xf32>
    %5 = arith.addf %2, %4 : vector<8x128xf32>
    %cst_5 = arith.constant 0.000000e+00 : f32
    %6 = vector.broadcast %cst_5 : f32 to vector<8x128xf32>
    %7 = arith.maximumf %5, %6 : vector<8x128xf32>
    %c0_6 = arith.constant 0 : index
    %c0_7 = arith.constant 0 : index
    %8 = vector.load %arg4[%c0_6, %c0_7] : memref<128x128xf32, #tpu.memory_space<vmem>>, vector<128x128xf32>
    %cst_8 = arith.constant dense<0.000000e+00> : vector<8x128xf32>
    %9 = tpu.matmul %7, %8, %cst_8 {dimension_numbers = #tpu.dot_dimension_numbers<[1], [0], [0], [1], [0, 0, 1, 1], [], []>} : vector<8x128xf32>, vector<128x128xf32>, vector<8x128xf32> -> vector<8x128xf32>
    %c0_9 = arith.constant 0 : index
    %c0_10 = arith.constant 0 : index
    %10 = vector.load %arg5[%c0_9, %c0_10] : memref<1x128xf32, #tpu.memory_space<vmem>>, vector<1x128xf32>
    %11 = vector.broadcast %10 : vector<1x128xf32> to vector<8x128xf32>
    %12 = arith.addf %9, %11 : vector<8x128xf32>
    %cst_11 = arith.constant 0.000000e+00 : f32
    %13 = vector.broadcast %cst_11 : f32 to vector<8x128xf32>
    %14 = arith.maximumf %12, %13 : vector<8x128xf32>
    %c0_12 = arith.constant 0 : index
    %c0_13 = arith.constant 0 : index
    %15 = vector.load %arg6[%c0_12, %c0_13] : memref<128x128xf32, #tpu.memory_space<vmem>>, vector<128x128xf32>
    %cst_14 = arith.constant dense<0.000000e+00> : vector<8x128xf32>
    %16 = tpu.matmul %14, %15, %cst_14 {dimension_numbers = #tpu.dot_dimension_numbers<[1], [0], [0], [1], [0, 0, 1, 1], [], []>} : vector<8x128xf32>, vector<128x128xf32>, vector<8x128xf32> -> vector<8x128xf32>
    %c0_15 = arith.constant 0 : index
    %c0_16 = arith.constant 0 : index
    %17 = vector.load %arg7[%c0_15, %c0_16] : memref<8x128xf32, #tpu.memory_space<vmem>>, vector<8x128xf32>
    %cst_17 = arith.constant dense<0.000000e+00> : vector<8x128xf32>
    %18 = tpu.matmul %0, %17, %cst_17 {dimension_numbers = #tpu.dot_dimension_numbers<[1], [0], [0], [1], [0, 0, 1, 1], [], []>} : vector<8x8xf32>, vector<8x128xf32>, vector<8x128xf32> -> vector<8x128xf32>
    %19 = arith.addf %16, %18 : vector<8x128xf32>
    %c0_18 = arith.constant 0 : index
    %c0_19 = arith.constant 0 : index
    %20 = vector.load %arg8[%c0_18, %c0_19] : memref<1x128xf32, #tpu.memory_space<vmem>>, vector<1x128xf32>
    %21 = vector.broadcast %20 : vector<1x128xf32> to vector<8x128xf32>
    %22 = arith.addf %19, %21 : vector<8x128xf32>
    %c0_20 = arith.constant 0 : index
    %c0_21 = arith.constant 0 : index
    %23 = vector.load %arg9[%c0_20, %c0_21] : memref<8x128xf32, #tpu.memory_space<vmem>>, vector<8x128xf32>
    tpu.vector_store %arg9[%c0_20, %c0_21], %22 {strides = array<i32>} : memref<8x128xf32, #tpu.memory_space<vmem>>, vector<8x128xf32>,
    return
  }
  func.func @transform_0(%arg0: i32) -> (i32, i32) {
    %c0_i32 = arith.constant 0 : i32
    %c0_i32_0 = arith.constant 0 : i32
    return %arg0, %c0_i32 : i32, i32
  }
  func.func @transform_1(%arg0: i32) -> (i32, i32) {
    %c0_i32 = arith.constant 0 : i32
    %c0_i32_0 = arith.constant 0 : i32
    %c0_i32_1 = arith.constant 0 : i32
    return %c0_i32, %c0_i32_0 : i32, i32
  }
  func.func @transform_2(%arg0: i32) -> (i32, i32) {
    %c0_i32 = arith.constant 0 : i32
    %c0_i32_0 = arith.constant 0 : i32
    %c0_i32_1 = arith.constant 0 : i32
    return %c0_i32, %c0_i32_0 : i32, i32
  }
  func.func @transform_3(%arg0: i32) -> (i32, i32) {
    %c0_i32 = arith.constant 0 : i32
    %c0_i32_0 = arith.constant 0 : i32
    %c0_i32_1 = arith.constant 0 : i32
    return %c0_i32, %c0_i32_0 : i32, i32
  }
  func.func @transform_4(%arg0: i32) -> (i32, i32) {
    %c0_i32 = arith.constant 0 : i32
    %c0_i32_0 = arith.constant 0 : i32
    %c0_i32_1 = arith.constant 0 : i32
    return %c0_i32, %c0_i32_0 : i32, i32
  }
  func.func @transform_5(%arg0: i32) -> (i32, i32) {
    %c0_i32 = arith.constant 0 : i32
    %c0_i32_0 = arith.constant 0 : i32
    %c0_i32_1 = arith.constant 0 : i32
    return %c0_i32, %c0_i32_0 : i32, i32
  }
  func.func @transform_6(%arg0: i32) -> (i32, i32) {
    %c0_i32 = arith.constant 0 : i32
    %c0_i32_0 = arith.constant 0 : i32
    %c0_i32_1 = arith.constant 0 : i32
    return %c0_i32, %c0_i32_0 : i32, i32
  }
  func.func @transform_7(%arg0: i32) -> (i32, i32) {
    %c0_i32 = arith.constant 0 : i32
    %c0_i32_0 = arith.constant 0 : i32
    %c0_i32_1 = arith.constant 0 : i32
    return %c0_i32, %c0_i32_0 : i32, i32
  }
  func.func @transform_8(%arg0: i32) -> (i32, i32) {
    %c0_i32 = arith.constant 0 : i32
    %c0_i32_0 = arith.constant 0 : i32
    return %arg0, %c0_i32 : i32, i32
  }
}

module attributes {stable_mosaic.version = 11 : i64} {
  func.func @made_kernel(%arg0: i32, %arg1: memref<8x8xf32, #tpu.memory_space<vmem>>, %arg2: memref<8x128xf32, #tpu.memory_space<vmem>>, %arg3: memref<1x128xf32, #tpu.memory_space<vmem>>, %arg4: memref<128x128xf32, #tpu.memory_space<vmem>>, %arg5: memref<1x128xf32, #tpu.memory_space<vmem>>, %arg6: memref<128x128xf32, #tpu.memory_space<vmem>>, %arg7: memref<8x128xf32, #tpu.memory_space<vmem>>, %arg8: memref<1x128xf32, #tpu.memory_space<vmem>>, %arg9: memref<8x128xf32, #tpu.memory_space<vmem>>) attributes {dimension_semantics = [#tpu.dimension_semantics<parallel>], iteration_bounds = array<i64: 1>, scalar_prefetch = 0 : i64, scratch_operands = 0 : i64, tpu.core_type = #tpu.core_type<tc>, window_params = [{transform_indices = @transform_0, window_bounds = array<i64: 8, 8>}, {pipeline_mode = #tpu.pipeline_mode<synchronous>, transform_indices = @transform_1, window_bounds = array<i64: 8, 128>}, {pipeline_mode = #tpu.pipeline_mode<synchronous>, transform_indices = @transform_2, window_bounds = array<i64: 1, 128>}, {pipeline_mode = #tpu.pipeline_mode<synchronous>, transform_indices = @transform_3, window_bounds = array<i64: 128, 128>}, {pipeline_mode = #tpu.pipeline_mode<synchronous>, transform_indices = @transform_4, window_bounds = array<i64: 1, 128>}, {pipeline_mode = #tpu.pipeline_mode<synchronous>, transform_indices = @transform_5, window_bounds = array<i64: 128, 128>}, {pipeline_mode = #tpu.pipeline_mode<synchronous>, transform_indices = @transform_6, window_bounds = array<i64: 8, 128>}, {pipeline_mode = #tpu.pipeline_mode<synchronous>, transform_indices = @transform_7, window_bounds = array<i64: 1, 128>}, {transform_indices = @transform_8, window_bounds = array<i64: 8, 128>}]} {
    %c0 = arith.constant 0 : index
    %c0_0 = arith.constant 0 : index
    %0 = vector.load %arg1[%c0, %c0_0] : memref<8x8xf32, #tpu.memory_space<vmem>>, vector<8x8xf32>
    %c0_1 = arith.constant 0 : index
    %c0_2 = arith.constant 0 : index
    %1 = vector.load %arg2[%c0_1, %c0_2] : memref<8x128xf32, #tpu.memory_space<vmem>>, vector<8x128xf32>
    %cst = arith.constant dense<0.000000e+00> : vector<8x128xf32>
    %2 = tpu.matmul %0, %1, %cst {dimension_numbers = #tpu.dot_dimension_numbers<[1], [0], [0], [1], [0, 0, 1, 1], [], []>} : vector<8x8xf32>, vector<8x128xf32>, vector<8x128xf32> -> vector<8x128xf32>
    %c0_3 = arith.constant 0 : index
    %c0_4 = arith.constant 0 : index
    %3 = vector.load %arg3[%c0_3, %c0_4] : memref<1x128xf32, #tpu.memory_space<vmem>>, vector<1x128xf32>
    %4 = vector.broadcast %3 : vector<1x128xf32> to vector<8x128xf32>
    %5 = arith.addf %2, %4 : vector<8x128xf32>
    %cst_5 = arith.constant 0.000000e+00 : f32
    %6 = vector.broadcast %cst_5 : f32 to vector<8x128xf32>
    %7 = arith.maximumf %5, %6 : vector<8x128xf32>
    %c0_6 = arith.constant 0 : index
    %c0_7 = arith.constant 0 : index
    %8 = vector.load %arg4[%c0_6, %c0_7] : memref<128x128xf32, #tpu.memory_space<vmem>>, vector<128x128xf32>
    %cst_8 = arith.constant dense<0.000000e+00> : vector<8x128xf32>
    %9 = tpu.matmul %7, %8, %cst_8 {dimension_numbers = #tpu.dot_dimension_numbers<[1], [0], [0], [1], [0, 0, 1, 1], [], []>} : vector<8x128xf32>, vector<128x128xf32>, vector<8x128xf32> -> vector<8x128xf32>
    %c0_9 = arith.constant 0 : index
    %c0_10 = arith.constant 0 : index
    %10 = vector.load %arg5[%c0_9, %c0_10] : memref<1x128xf32, #tpu.memory_space<vmem>>, vector<1x128xf32>
    %11 = vector.broadcast %10 : vector<1x128xf32> to vector<8x128xf32>
    %12 = arith.addf %9, %11 : vector<8x128xf32>
    %cst_11 = arith.constant 0.000000e+00 : f32
    %13 = vector.broadcast %cst_11 : f32 to vector<8x128xf32>
    %14 = arith.maximumf %12, %13 : vector<8x128xf32>
    %c0_12 = arith.constant 0 : index
    %c0_13 = arith.constant 0 : index
    %15 = vector.load %arg6[%c0_12, %c0_13] : memref<128x128xf32, #tpu.memory_space<vmem>>, vector<128x128xf32>
    %cst_14 = arith.constant dense<0.000000e+00> : vector<8x128xf32>
    %16 = tpu.matmul %14, %15, %cst_14 {dimension_numbers = #tpu.dot_dimension_numbers<[1], [0], [0], [1], [0, 0, 1, 1], [], []>} : vector<8x128xf32>, vector<128x128xf32>, vector<8x128xf32> -> vector<8x128xf32>
    %c0_15 = arith.constant 0 : index
    %c0_16 = arith.constant 0 : index
    %17 = vector.load %arg7[%c0_15, %c0_16] : memref<8x128xf32, #tpu.memory_space<vmem>>, vector<8x128xf32>
    %cst_17 = arith.constant dense<0.000000e+00> : vector<8x128xf32>
    %18 = tpu.matmul %0, %17, %cst_17 {dimension_numbers = #tpu.dot_dimension_numbers<[1], [0], [0], [1], [0, 0, 1, 1], [], []>} : vector<8x8xf32>, vector<8x128xf32>, vector<8x128xf32> -> vector<8x128xf32>
    %19 = arith.addf %16, %18 : vector<8x128xf32>
    %c0_18 = arith.constant 0 : index
    %c0_19 = arith.constant 0 : index
    %20 = vector.load %arg8[%c0_18, %c0_19] : memref<1x128xf32, #tpu.memory_space<vmem>>, vector<1x128xf32>
    %21 = vector.broadcast %20 : vector<1x128xf32> to vector<8x128xf32>
    %22 = arith.addf %19, %21 : vector<8x128xf32>
    %c0_20 = arith.constant 0 : index
    %c0_21 = arith.constant 0 : index
    %23 = vector.load %arg9[%c0_20, %c0_21] : memref<8x128xf32, #tpu.memory_space<vmem>>, vector<8x128xf32>
    tpu.vector_store %arg9[%c0_20, %c0_21], %22 {strides = array<i32>} : memref<8x128xf32, #tpu.memory_space<vmem>>, vector<8x128xf32>,
    return
  }
  func.func @transform_0(%arg0: i32) -> (i32, i32) {
    %c0_i32 = arith.constant 0 : i32
    %c0_i32_0 = arith.constant 0 : i32
    return %arg0, %c0_i32 : i32, i32
  }
  func.func @transform_1(%arg0: i32) -> (i32, i32) {
    %c0_i32 = arith.constant 0 : i32
    %c0_i32_0 = arith.constant 0 : i32
    %c0_i32_1 = arith.constant 0 : i32
    return %c0_i32, %c0_i32_0 : i32, i32
  }
  func.func @transform_2(%arg0: i32) -> (i32, i32) {
    %c0_i32 = arith.constant 0 : i32
    %c0_i32_0 = arith.constant 0 : i32
    %c0_i32_1 = arith.constant 0 : i32
    return %c0_i32, %c0_i32_0 : i32, i32
  }
  func.func @transform_3(%arg0: i32) -> (i32, i32) {
    %c0_i32 = arith.constant 0 : i32
    %c0_i32_0 = arith.constant 0 : i32
    %c0_i32_1 = arith.constant 0 : i32
    return %c0_i32, %c0_i32_0 : i32, i32
  }
  func.func @transform_4(%arg0: i32) -> (i32, i32) {
    %c0_i32 = arith.constant 0 : i32
    %c0_i32_0 = arith.constant 0 : i32
    %c0_i32_1 = arith.constant 0 : i32
    return %c0_i32, %c0_i32_0 : i32, i32
  }
  func.func @transform_5(%arg0: i32) -> (i32, i32) {
    %c0_i32 = arith.constant 0 : i32
    %c0_i32_0 = arith.constant 0 : i32
    %c0_i32_1 = arith.constant 0 : i32
    return %c0_i32, %c0_i32_0 : i32, i32
  }
  func.func @transform_6(%arg0: i32) -> (i32, i32) {
    %c0_i32 = arith.constant 0 : i32
    %c0_i32_0 = arith.constant 0 : i32
    %c0_i32_1 = arith.constant 0 : i32
    return %c0_i32, %c0_i32_0 : i32, i32
  }
  func.func @transform_7(%arg0: i32) -> (i32, i32) {
    %c0_i32 = arith.constant 0 : i32
    %c0_i32_0 = arith.constant 0 : i32
    %c0_i32_1 = arith.constant 0 : i32
    return %c0_i32, %c0_i32_0 : i32, i32
  }
  func.func @transform_8(%arg0: i32) -> (i32, i32) {
    %c0_i32 = arith.constant 0 : i32
    %c0_i32_0 = arith.constant 0 : i32
    return %arg0, %c0_i32 : i32, i32
  }
}

</mosaic_0001>

<bundles_post_ra>
// kernel: tpu_custom_call.1
= control target key start
LH: loop header
LB: loop body
LE: loop exit
PB: predicated region body
PF: predicated region fallthrough
CT: control target
= control target key end

     0   :  { %13 = vsyncpa [#allocation3], 0  ;;  %s896_s0 = inlined_call_operand.hbm [shape: f32[8,8], index: 0, kind: input, shape index: {}]   ;;  %s897_s1 = inlined_call_operand.hbm [shape: f32[8,128], index: 1, kind: input, shape index: {}]   ;;  %s898_s2 = inlined_call_operand.vmem [shape: f32[1,128], index: 2, kind: input, shape index: {}]   ;;  %s899_s3 = inlined_call_operand.hbm [shape: f32[128,128], index: 3, kind: input, shape index: {}]   ;;  %s900_s4 = inlined_call_operand.vmem [shape: f32[1,128], index: 4, kind: input, shape index: {}]   ;;  %s901_s5 = inlined_call_operand.hbm [shape: f32[128,128], index: 5, kind: input, shape index: {}]   ;;  %s902_s6 = inlined_call_operand.vmem [shape: f32[8,128], index: 6, kind: input, shape index: {}]   ;;  %s903_s7 = inlined_call_operand.vmem [shape: f32[1,128], index: 7, kind: input, shape index: {}]   ;;  %s904_s8 = inlined_call_operand.hbm [shape: f32[8,128], index: 8, kind: output, shape index: {}]  }
   0x1   :  { %14 = vsyncpa [#allocation6], 0 }
   0x2   :  { %15 = vsyncpa [#allocation9], 0 }
   0x3   :  { %16 = vsyncpa [#allocation4], 0  ;;  %s741_s27 = smov [#allocation5]   ;;  %s742_s29 = smov [#allocation2]  }
   0x4   :  { %s33_s28 = sshll.u32 %s741_s27, 4  ;;  %s23_s30 = sshll.u32 %s742_s29, 4  ;;  %s34_s28 = int_to_ptr.vmem [resolvable:$true] %s33_s28  ;;  %s24_s30 = int_to_ptr.vmem [resolvable:$true] %s23_s30 }
   0x5   :  { %s623_s11 = scalar_lea.hbm %s897_s1, 128 }
   0x6   :  { %p624_p0 = scmp.ne.s32.totalorder %s897_s1, %s623_s11  ;;  %p627_p1 = scmp.lt.u32.totalorder %s623_s11, %s897_s1 }
   0x8   :  { %p629_p2 = pnand %p627_p1, %p624_p0 }
   0xa   :  { %632 = shalt.err (!%p629_p2)
}
   0xb   :  { %s633_s16 = scalar_lea.vmem %s34_s28, 128  ;;  %p638_p4 = scmp.lt.s32.totalorder %s34_s28, %s34_s28 }
   0xc   :  { %p634_p3 = scmp.ne.s32.totalorder %s34_s28, %s633_s16  ;;  %p639_p5 = scmp.lt.s32.totalorder %s633_s16, %s633_s16 }
   0xe   :  { %p640_p6 = por %p639_p5, %p638_p4 }
  0x10   :  { %p641_p7 = pnand %p640_p6, %p634_p3 }
  0x12   :  { %644 = shalt.err (!%p641_p7)
}
  0x13   :  { %36 = dma.hbm_to_vmem [thread:$0]  %s897_s1, 128, %s34_s28, [#allocation6]  }
  0x14   :  { %s645_s21 = scalar_lea.hbm %s896_s0, 128 }
  0x15   :  { %p646_p8 = scmp.ne.s32.totalorder %s896_s0, %s645_s21  ;;  %p649_p9 = scmp.lt.u32.totalorder %s645_s21, %s896_s0 }
  0x17   :  { %p651_p10 = pnand %p649_p9, %p646_p8 }
  0x19   :  { %654 = shalt.err (!%p651_p10)
}
  0x1a   :  { %s655_s26 = scalar_lea.vmem %s24_s30, 128  ;;  %p660_p12 = scmp.lt.s32.totalorder %s24_s30, %s24_s30 }
  0x1b   :  { %p656_p11 = scmp.ne.s32.totalorder %s24_s30, %s655_s26  ;;  %p661_p13 = scmp.lt.s32.totalorder %s655_s26, %s655_s26 }
  0x1d   :  { %p662_p0 = por %p661_p13, %p660_p12 }
  0x1f   :  { %p663_p1 = pnand %p662_p0, %p656_p11 }
  0x21   :  { %666 = shalt.err (!%p663_p1)
}
  0x22   :  { %26 = dma.hbm_to_vmem [thread:$0]  %s896_s0, 128, %s24_s30, [#allocation3]  }
  0x23   :  { %s743_s28 = smov [#allocation7]   ;;  %s667_s11 = scalar_lea.hbm %s899_s3, 2048 }
  0x24   :  { %s44_s29 = sshll.u32 %s743_s28, 4  ;;  %p668_p2 = scmp.ne.s32.totalorder %s899_s3, %s667_s11  ;;  %s45_s29 = int_to_ptr.vmem [resolvable:$true] %s44_s29 }
  0x25   :  { %p671_p3 = scmp.lt.u32.totalorder %s667_s11, %s899_s3 }
  0x27   :  { %p673_p4 = pnand %p671_p3, %p668_p2 }
  0x29   :  { %676 = shalt.err (!%p673_p4)
}
  0x2a   :  { %s677_s16 = scalar_lea.vmem %s45_s29, 2048  ;;  %p682_p6 = scmp.lt.s32.totalorder %s45_s29, %s45_s29 }
  0x2b   :  { %p678_p5 = scmp.ne.s32.totalorder %s45_s29, %s677_s16  ;;  %p683_p7 = scmp.lt.s32.totalorder %s677_s16, %s677_s16 }
  0x2d   :  { %p684_p8 = por %p683_p7, %p682_p6 }
  0x2f   :  { %p685_p9 = pnand %p684_p8, %p678_p5 }
  0x31   :  { %688 = shalt.err (!%p685_p9)
}
  0x32   :  { %s744_s0 = smov 128   ;;  %s745_s30 = smov 8  }
  0x33   :  { %50 = dma.hbm_to_vmem [thread:$0]  %s899_s3, 2048, %s45_s29, [#allocation6], %s744_s0, %s744_s0, %s745_s30  }
  0x34   :  { %s746_s19 = smov [#allocation8]   ;;  %s689_s23 = scalar_lea.hbm %s901_s5, 2048 }
  0x35   :  { %s58_s20 = sshll.u32 %s746_s19, 4  ;;  %p690_p10 = scmp.ne.s32.totalorder %s901_s5, %s689_s23  ;;  %s59_s20 = int_to_ptr.vmem [resolvable:$true] %s58_s20 }
  0x36   :  { %p693_p11 = scmp.lt.u32.totalorder %s689_s23, %s901_s5 }
  0x38   :  { %p695_p12 = pnand %p693_p11, %p690_p10 }
  0x3a   :  { %698 = shalt.err (!%p695_p12)
}
  0x3b   :  { %s699_s27 = scalar_lea.vmem %s59_s20, 2048  ;;  %p704_p0 = scmp.lt.s32.totalorder %s59_s20, %s59_s20 }
  0x3c   :  { %p700_p13 = scmp.ne.s32.totalorder %s59_s20, %s699_s27  ;;  %p705_p1 = scmp.lt.s32.totalorder %s699_s27, %s699_s27 }
  0x3e   :  { %p706_p2 = por %p705_p1, %p704_p0 }
  0x40   :  { %p707_p3 = pnand %p706_p2, %p700_p13 }
  0x42   :  { %710 = shalt.err (!%p707_p3)
}
  0x43   :  { %64 = dma.hbm_to_vmem [thread:$0]  %s901_s5, 2048, %s59_s20, [#allocation9], %s744_s0, %s744_s0, %s745_s30  }
  0x44   :  { %733 = dma.done.wait [#allocation3], 128  }
  0x45   :  { %734 = vsyncadd [#allocation3], 4294967168 }
  0x46   :  { %735 = dma.done.wait [#allocation6], 2176  }
  0x47   :  { %736 = vsyncadd [#allocation6], 4294965120 }
  0x48   :  { %737 = dma.done.wait [#allocation9], 2048  }
  0x49   :  { %738 = vsyncadd [#allocation9], 4294965248  ;;  %v747_v0 = vmov 0.0   ;;  %vm748_vm0 = vmmov 0   ;;  %vm90_vm1 = vcmask 64512   ;;  %v82_v1 = vld [vmem:[#allocation5] sm:$0xff] }
  0x4a   :  { %485 = vmatprep.subr.mxu1 %v747_v0  ;;  %487 = vmatprep.mubr.msk.f32.mxu1 %vm748_vm0, %v747_v0  ;;  %v81_v2 = vld [vmem:[#allocation2] sm:$0xff]  ;;  %v165_v3 = vld [vmem:[#allocation7] sm:$0xff]  ;;  %v166_v4 = vld [vmem:[#allocation7 + $0x8] sm:$0xff]  ;;  %v749_v7 = vmov 0.0|0.0   ;;  %s750_s13 = smov [#allocation10]  }
  0x4b   :  { %525 = vmatprep.subr.mxu0 %v747_v0  ;;  %527 = vmatprep.mubr.msk.f32.mxu0 %vm748_vm0, %v747_v0  ;;  %v167_v5 = vld [vmem:[#allocation7 + $0x10] sm:$0xff]  ;;  %v168_v6 = vld [vmem:[#allocation7 + $0x18] sm:$0xff]  ;;  %v566_v8 = vpack.c.bf16 %v166_v4, %v165_v3  ;;  %v169_v10 = vld [vmem:[#allocation7 + $0x20] sm:$0xff]  ;;  %s431_s14 = sshll.u32 %s750_s13, 4  ;;  %s432_s14 = int_to_ptr.vmem [resolvable:$true] %s431_s14 }
  0x4c   :  { %486 = vmatpush3.msra.mxu1 %v82_v1  ;;  %v569_v9 = vpack.c.bf16 %v168_v6, %v167_v5  ;;  %v170_v11 = vld [vmem:[#allocation7 + $0x28] sm:$0xff]  ;;  %v171_v13 = vld [vmem:[#allocation7 + $0x30] sm:$0xff]  ;;  %v172_v14 = vld [vmem:[#allocation7 + $0x38] sm:$0xff]  ;;  %s711_s15 = scalar_lea.vmem %s432_s14, 128  ;;  %p716_p5 = scmp.lt.s32.totalorder %s432_s14, %s432_s14 }
  0x4d   :  { %488 = vmatmul.mubr.msk.f32.vlgmr.msra.gmra.mrb[0].mxu1 %vm90_vm1, %v81_v2  ;;  %565 = vmatprep.subr.bf16.mxu1 %v749_v7  ;;  %v572_v12 = vpack.c.bf16 %v170_v11, %v169_v10  ;;  %v575_v15 = vpack.c.bf16 %v172_v14, %v171_v13  ;;  %v173_v16 = vld [vmem:[#allocation7 + $0x40] sm:$0xff]  ;;  %v174_v17 = vld [vmem:[#allocation7 + $0x48] sm:$0xff]  ;;  %v175_v19 = vld [vmem:[#allocation7 + $0x50] sm:$0xff]  ;;  %p712_p4 = scmp.ne.s32.totalorder %s432_s14, %s711_s15  ;;  %p717_p6 = scmp.lt.s32.totalorder %s711_s15, %s711_s15 }
  0x4e   :  { %522 = vmatprep.mubr.msk.f32.mxu1 %vm748_vm0, %v747_v0  ;;  %567 = vmatpush3.bf16.msra.mxu1 %v566_v8  ;;  %v578_v18 = vpack.c.bf16 %v174_v17, %v173_v16  ;;  %v176_v20 = vld [vmem:[#allocation7 + $0x58] sm:$0xff]  ;;  %v177_v22 = vld [vmem:[#allocation7 + $0x60] sm:$0xff]  ;;  %v178_v23 = vld [vmem:[#allocation7 + $0x68] sm:$0xff] }
  0x4f   :  { %568 = vmatprep.subr.bf16.mxu1 %v749_v7  ;;  %v581_v21 = vpack.c.bf16 %v176_v20, %v175_v19  ;;  %v584_v24 = vpack.c.bf16 %v178_v23, %v177_v22  ;;  %v179_v25 = vld [vmem:[#allocation7 + $0x70] sm:$0xff]  ;;  %v180_v26 = vld [vmem:[#allocation7 + $0x78] sm:$0xff]  ;;  %v259_v29 = vld [vmem:[#allocation8] sm:$0xff]  ;;  %p718_p7 = por %p717_p6, %p716_p5 }
  0x50   :  { %v587_v27 = vpack.c.bf16 %v180_v26, %v179_v25  ;;  %v275_v28 = vld [vmem:[%s902_s6] sm:$0xff]  ;;  %v260_v30 = vld [vmem:[#allocation8 + $0x8] sm:$0xff]  ;;  %v262_v33 = vld [vmem:[#allocation8 + $0x18] sm:$0xff] }
  0x51   :  { %526 = vmatpush3.msra.mxu0 %v275_v28  ;;  %v590_v31 = vpack.c.bf16 %v260_v30, %v259_v29  ;;  %v261_v32 = vld [vmem:[#allocation8 + $0x10] sm:$0xff]  ;;  %v263_v35 = vld [vmem:[#allocation8 + $0x20] sm:$0xff]  ;;  %v264_v36 = vld [vmem:[#allocation8 + $0x28] sm:$0xff]  ;;  %p719_p8 = pnand %p718_p7, %p712_p4 }
  0x52   :  { %570 = vmatpush3.bf16.msra.mxu1 %v569_v9  ;;  %528 = vmatmul.mubr.msk.f32.vlgmr.msra.gmra.mrb[0].mxu0 %vm90_vm1, %v81_v2  ;;  %v593_v34 = vpack.c.bf16 %v262_v33, %v261_v32  ;;  %v596_v37 = vpack.c.bf16 %v264_v36, %v263_v35  ;;  %v265_v38 = vld [vmem:[#allocation8 + $0x30] sm:$0xff]  ;;  %v266_v39 = vld [vmem:[#allocation8 + $0x38] sm:$0xff]  ;;  %v267_v41 = vld [vmem:[#allocation8 + $0x40] sm:$0xff] }
  0x53   :  { %571 = vmatprep.subr.bf16.mxu1 %v749_v7  ;;  %589 = vmatprep.subr.bf16.mxu0 %v749_v7  ;;  %v599_v40 = vpack.c.bf16 %v266_v39, %v265_v38  ;;  %v268_v42 = vld [vmem:[#allocation8 + $0x48] sm:$0xff]  ;;  %v269_v44 = vld [vmem:[#allocation8 + $0x50] sm:$0xff]  ;;  %v270_v45 = vld [vmem:[#allocation8 + $0x58] sm:$0xff] }
  0x54   :  { %591 = vmatpush3.bf16.msra.mxu0 %v590_v31  ;;  %562 = vmatprep.mubr.msk.f32.mxu0 %vm748_vm0, %v747_v0  ;;  %v602_v43 = vpack.c.bf16 %v268_v42, %v267_v41  ;;  %v605_v46 = vpack.c.bf16 %v270_v45, %v269_v44  ;;  %v271_v47 = vld [vmem:[#allocation8 + $0x60] sm:$0xff]  ;;  %v272_v48 = vld [vmem:[#allocation8 + $0x68] sm:$0xff]  ;;  %v442_v50 = vld [vmem:[%s898_s2] ss:$0 sm:$0xff] }
  0x55   :  { %592 = vmatprep.subr.bf16.mxu0 %v749_v7  ;;  %v608_v49 = vpack.c.bf16 %v272_v48, %v271_v47  ;;  %v273_v55 = vld [vmem:[#allocation8 + $0x70] sm:$0xff]  ;;  %v274_v56 = vld [vmem:[#allocation8 + $0x78] sm:$0xff] }
  0x56   :  { %573 = vmatpush3.bf16.msra.mxu1 %v572_v12  ;;  %v611_v57 = vpack.c.bf16 %v274_v56, %v273_v55  ;;  %v444_v60 = vld [vmem:[%s900_s4] ss:$0 sm:$0xff] }
  0x57   :  { %574 = vmatprep.subr.bf16.mxu1 %v749_v7  ;;  %v446_v2 = vld [vmem:[%s903_s7] ss:$0 sm:$0xff] }
  0x58   :  { %594 = vmatpush3.bf16.msra.mxu0 %v593_v34 }
  0x59   :  { %595 = vmatprep.subr.bf16.mxu0 %v749_v7 }
  0x5a   :  { %576 = vmatpush3.bf16.msra.mxu1 %v575_v15 }
  0x5b   :  { %577 = vmatprep.subr.bf16.mxu1 %v749_v7 }
  0x5c   :  { %597 = vmatpush3.bf16.msra.mxu0 %v596_v37 }
  0x5d   :  { %598 = vmatprep.subr.bf16.mxu0 %v749_v7 }
  0x5e   :  { %579 = vmatpush3.bf16.msra.mxu1 %v578_v18 }
  0x5f   :  { %580 = vmatprep.subr.bf16.mxu1 %v749_v7 }
  0x60   :  { %600 = vmatpush3.bf16.msra.mxu0 %v599_v40 }
  0x61   :  { %601 = vmatprep.subr.bf16.mxu0 %v749_v7 }
  0x62   :  { %582 = vmatpush3.bf16.msra.mxu1 %v581_v21 }
  0x63   :  { %583 = vmatprep.subr.bf16.mxu1 %v749_v7 }
  0x64   :  { %603 = vmatpush3.bf16.msra.mxu0 %v602_v43 }
  0x65   :  { %604 = vmatprep.subr.bf16.mxu0 %v749_v7 }
  0x66   :  { %585 = vmatpush3.bf16.msra.mxu1 %v584_v24 }
  0x67   :  { %586 = vmatprep.subr.bf16.mxu1 %v749_v7 }
  0x68   :  { %606 = vmatpush3.bf16.msra.mxu0 %v605_v46 }
  0x69   :  { %607 = vmatprep.subr.bf16.mxu0 %v749_v7 }
  0x6a   :  { %588 = vmatpush3.bf16.msra.mxu1 %v587_v27 }
  0x6c   :  { %609 = vmatpush3.bf16.msra.mxu0 %v608_v49 }
  0x6d   :  { %610 = vmatprep.subr.bf16.mxu0 %v749_v7 }
  0x70   :  { %612 = vmatpush3.bf16.msra.mxu0 %v611_v57 }
 0x120   :  { %v160_v51 = vpop.f32.mrb[0].mxu1 }
 0x121   :  { %v161_v52 = vadd.f32 %v442_v50, %v160_v51  ;;  %v489_v53 = vpop.f32.mrb[1].mxu1 }
 0x123   :  { %v164_v54 = vmax.f32 %v161_v52, 0.0 }
 0x125   :  { %523 = vmatmul.mubr.f32.vlgmr.msra.gmra.mrb[2].mxu1 %v164_v54  ;;  %v342_v58 = vpop.f32.mrb[0].mxu0 }
 0x126   :  { %v529_v59 = vpop.f32.mrb[1].mxu0 }
 0x1f8   :  { %v254_v61 = vpop.f32.mrb[2].mxu1 }
 0x1f9   :  { %v255_v62 = vadd.f32 %v444_v60, %v254_v61  ;;  %v524_v63 = vpop.f32.mrb[3].mxu1 }
 0x1fb   :  { %v258_v0 = vmax.f32 %v255_v62, 0.0 }
 0x1fd   :  { %563 = vmatmul.mubr.f32.vlgmr.msra.gmra.mrb[2].mxu0 %v258_v0 }
 0x2d0   :  { %v412_v1 = vpop.f32.mrb[2].mxu0 }
 0x2d1   :  { %v413_v3 = vadd.f32 %v412_v1, %v342_v58  ;;  %v564_v4 = vpop.f32.mrb[3].mxu0 }
 0x2d3   :  { %v423_v5 = vadd.f32 %v446_v2, %v413_v3 }
 0x2d5   :  { %424 = vst [vmem:[#allocation10] sm:$0xff] %v423_v5 }
 0x2d6   :  { %722 = shalt.err (!%p719_p8)
}
 0x2d7   :  { %s723_s0 = scalar_lea.hbm %s904_s8, 128 }
 0x2d8   :  { %p724_p9 = scmp.ne.s32.totalorder %s904_s8, %s723_s0  ;;  %p727_p10 = scmp.lt.u32.totalorder %s723_s0, %s904_s8 }
 0x2da   :  { %p729_p11 = pnand %p727_p10, %p724_p9 }
 0x2dc   :  { %732 = shalt.err (!%p729_p11)
}
 0x2dd   :  { %434 = dma.vmem_to_hbm [thread:$0]  %s432_s14, 128, %s904_s8, [#allocation4]  }
 0x2de   :  { %739 = dma.done.wait [#allocation4], 128  }
 0x2df   :  { %740 = vsyncadd [#allocation4], 4294967168 }
 0x2e0   :  { %438 = vsyncpa [#allocation3], 1 }
 0x2e1   :  { %439 = vsyncpa [#allocation6], 1 }
 0x2e2   :  { %440 = vsyncpa [#allocation9], 1 }
 0x2e3   :  { %441 = vsyncpa [#allocation4], 1 }

// kernel: tpu_custom_call.1
= control target key start
LH: loop header
LB: loop body
LE: loop exit
PB: predicated region body
PF: predicated region fallthrough
CT: control target
= control target key end

     0   :  { %13 = vsyncpa [#allocation3], 0  ;;  %s896_s0 = inlined_call_operand.hbm [shape: f32[8,8], index: 0, kind: input, shape index: {}]   ;;  %s897_s1 = inlined_call_operand.hbm [shape: f32[8,128], index: 1, kind: input, shape index: {}]   ;;  %s898_s2 = inlined_call_operand.vmem [shape: f32[1,128], index: 2, kind: input, shape index: {}]   ;;  %s899_s3 = inlined_call_operand.hbm [shape: f32[128,128], index: 3, kind: input, shape index: {}]   ;;  %s900_s4 = inlined_call_operand.vmem [shape: f32[1,128], index: 4, kind: input, shape index: {}]   ;;  %s901_s5 = inlined_call_operand.hbm [shape: f32[128,128], index: 5, kind: input, shape index: {}]   ;;  %s902_s6 = inlined_call_operand.vmem [shape: f32[8,128], index: 6, kind: input, shape index: {}]   ;;  %s903_s7 = inlined_call_operand.vmem [shape: f32[1,128], index: 7, kind: input, shape index: {}]   ;;  %s904_s8 = inlined_call_operand.hbm [shape: f32[8,128], index: 8, kind: output, shape index: {}]  }
   0x1   :  { %14 = vsyncpa [#allocation6], 0 }
   0x2   :  { %15 = vsyncpa [#allocation9], 0 }
   0x3   :  { %16 = vsyncpa [#allocation4], 0  ;;  %s741_s27 = smov [#allocation5]   ;;  %s742_s29 = smov [#allocation2]  }
   0x4   :  { %s33_s28 = sshll.u32 %s741_s27, 4  ;;  %s23_s30 = sshll.u32 %s742_s29, 4  ;;  %s34_s28 = int_to_ptr.vmem [resolvable:$true] %s33_s28  ;;  %s24_s30 = int_to_ptr.vmem [resolvable:$true] %s23_s30 }
   0x5   :  { %s623_s11 = scalar_lea.hbm %s897_s1, 128 }
   0x6   :  { %p624_p0 = scmp.ne.s32.totalorder %s897_s1, %s623_s11  ;;  %p627_p1 = scmp.lt.u32.totalorder %s623_s11, %s897_s1 }
   0x8   :  { %p629_p2 = pnand %p627_p1, %p624_p0 }
   0xa   :  { %632 = shalt.err (!%p629_p2)
}
   0xb   :  { %s633_s16 = scalar_lea.vmem %s34_s28, 128  ;;  %p638_p4 = scmp.lt.s32.totalorder %s34_s28, %s34_s28 }
   0xc   :  { %p634_p3 = scmp.ne.s32.totalorder %s34_s28, %s633_s16  ;;  %p639_p5 = scmp.lt.s32.totalorder %s633_s16, %s633_s16 }
   0xe   :  { %p640_p6 = por %p639_p5, %p638_p4 }
  0x10   :  { %p641_p7 = pnand %p640_p6, %p634_p3 }
  0x12   :  { %644 = shalt.err (!%p641_p7)
}
  0x13   :  { %36 = dma.hbm_to_vmem [thread:$0]  %s897_s1, 128, %s34_s28, [#allocation6]  }
  0x14   :  { %s645_s21 = scalar_lea.hbm %s896_s0, 128 }
  0x15   :  { %p646_p8 = scmp.ne.s32.totalorder %s896_s0, %s645_s21  ;;  %p649_p9 = scmp.lt.u32.totalorder %s645_s21, %s896_s0 }
  0x17   :  { %p651_p10 = pnand %p649_p9, %p646_p8 }
  0x19   :  { %654 = shalt.err (!%p651_p10)
}
  0x1a   :  { %s655_s26 = scalar_lea.vmem %s24_s30, 128  ;;  %p660_p12 = scmp.lt.s32.totalorder %s24_s30, %s24_s30 }
  0x1b   :  { %p656_p11 = scmp.ne.s32.totalorder %s24_s30, %s655_s26  ;;  %p661_p13 = scmp.lt.s32.totalorder %s655_s26, %s655_s26 }
  0x1d   :  { %p662_p0 = por %p661_p13, %p660_p12 }
  0x1f   :  { %p663_p1 = pnand %p662_p0, %p656_p11 }
  0x21   :  { %666 = shalt.err (!%p663_p1)
}
  0x22   :  { %26 = dma.hbm_to_vmem [thread:$0]  %s896_s0, 128, %s24_s30, [#allocation3]  }
  0x23   :  { %s743_s28 = smov [#allocation7]   ;;  %s667_s11 = scalar_lea.hbm %s899_s3, 2048 }
  0x24   :  { %s44_s29 = sshll.u32 %s743_s28, 4  ;;  %p668_p2 = scmp.ne.s32.totalorder %s899_s3, %s667_s11  ;;  %s45_s29 = int_to_ptr.vmem [resolvable:$true] %s44_s29 }
  0x25   :  { %p671_p3 = scmp.lt.u32.totalorder %s667_s11, %s899_s3 }
  0x27   :  { %p673_p4 = pnand %p671_p3, %p668_p2 }
  0x29   :  { %676 = shalt.err (!%p673_p4)
}
  0x2a   :  { %s677_s16 = scalar_lea.vmem %s45_s29, 2048  ;;  %p682_p6 = scmp.lt.s32.totalorder %s45_s29, %s45_s29 }
  0x2b   :  { %p678_p5 = scmp.ne.s32.totalorder %s45_s29, %s677_s16  ;;  %p683_p7 = scmp.lt.s32.totalorder %s677_s16, %s677_s16 }
  0x2d   :  { %p684_p8 = por %p683_p7, %p682_p6 }
  0x2f   :  { %p685_p9 = pnand %p684_p8, %p678_p5 }
  0x31   :  { %688 = shalt.err (!%p685_p9)
}
  0x32   :  { %s744_s0 = smov 128   ;;  %s745_s30 = smov 8  }
  0x33   :  { %50 = dma.hbm_to_vmem [thread:$0]  %s899_s3, 2048, %s45_s29, [#allocation6], %s744_s0, %s744_s0, %s745_s30  }
  0x34   :  { %s746_s19 = smov [#allocation8]   ;;  %s689_s23 = scalar_lea.hbm %s901_s5, 2048 }
  0x35   :  { %s58_s20 = sshll.u32 %s746_s19, 4  ;;  %p690_p10 = scmp.ne.s32.totalorder %s901_s5, %s689_s23  ;;  %s59_s20 = int_to_ptr.vmem [resolvable:$true] %s58_s20 }
  0x36   :  { %p693_p11 = scmp.lt.u32.totalorder %s689_s23, %s901_s5 }
  0x38   :  { %p695_p12 = pnand %p693_p11, %p690_p10 }
  0x3a   :  { %698 = shalt.err (!%p695_p12)
}
  0x3b   :  { %s699_s27 = scalar_lea.vmem %s59_s20, 2048  ;;  %p704_p0 = scmp.lt.s32.totalorder %s59_s20, %s59_s20 }
  0x3c   :  { %p700_p13 = scmp.ne.s32.totalorder %s59_s20, %s699_s27  ;;  %p705_p1 = scmp.lt.s32.totalorder %s699_s27, %s699_s27 }
  0x3e   :  { %p706_p2 = por %p705_p1, %p704_p0 }
  0x40   :  { %p707_p3 = pnand %p706_p2, %p700_p13 }
  0x42   :  { %710 = shalt.err (!%p707_p3)
}
  0x43   :  { %64 = dma.hbm_to_vmem [thread:$0]  %s901_s5, 2048, %s59_s20, [#allocation9], %s744_s0, %s744_s0, %s745_s30  }
  0x44   :  { %733 = dma.done.wait [#allocation3], 128  }
  0x45   :  { %734 = vsyncadd [#allocation3], 4294967168 }
  0x46   :  { %735 = dma.done.wait [#allocation6], 2176  }
  0x47   :  { %736 = vsyncadd [#allocation6], 4294965120 }
  0x48   :  { %737 = dma.done.wait [#allocation9], 2048  }
  0x49   :  { %738 = vsyncadd [#allocation9], 4294965248  ;;  %v747_v0 = vmov 0.0   ;;  %vm748_vm0 = vmmov 0   ;;  %vm90_vm1 = vcmask 64512   ;;  %v82_v1 = vld [vmem:[#allocation5] sm:$0xff] }
  0x4a   :  { %485 = vmatprep.subr.mxu1 %v747_v0  ;;  %487 = vmatprep.mubr.msk.f32.mxu1 %vm748_vm0, %v747_v0  ;;  %v81_v2 = vld [vmem:[#allocation2] sm:$0xff]  ;;  %v165_v3 = vld [vmem:[#allocation7] sm:$0xff]  ;;  %v166_v4 = vld [vmem:[#allocation7 + $0x8] sm:$0xff]  ;;  %v749_v7 = vmov 0.0|0.0   ;;  %s750_s13 = smov [#allocation10]  }
  0x4b   :  { %525 = vmatprep.subr.mxu0 %v747_v0  ;;  %527 = vmatprep.mubr.msk.f32.mxu0 %vm748_vm0, %v747_v0  ;;  %v167_v5 = vld [vmem:[#allocation7 + $0x10] sm:$0xff]  ;;  %v168_v6 = vld [vmem:[#allocation7 + $0x18] sm:$0xff]  ;;  %v566_v8 = vpack.c.bf16 %v166_v4, %v165_v3  ;;  %v169_v10 = vld [vmem:[#allocation7 + $0x20] sm:$0xff]  ;;  %s431_s14 = sshll.u32 %s750_s13, 4  ;;  %s432_s14 = int_to_ptr.vmem [resolvable:$true] %s431_s14 }
  0x4c   :  { %486 = vmatpush3.msra.mxu1 %v82_v1  ;;  %v569_v9 = vpack.c.bf16 %v168_v6, %v167_v5  ;;  %v170_v11 = vld [vmem:[#allocation7 + $0x28] sm:$0xff]  ;;  %v171_v13 = vld [vmem:[#allocation7 + $0x30] sm:$0xff]  ;;  %v172_v14 = vld [vmem:[#allocation7 + $0x38] sm:$0xff]  ;;  %s711_s15 = scalar_lea.vmem %s432_s14, 128  ;;  %p716_p5 = scmp.lt.s32.totalorder %s432_s14, %s432_s14 }
  0x4d   :  { %488 = vmatmul.mubr.msk.f32.vlgmr.msra.gmra.mrb[0].mxu1 %vm90_vm1, %v81_v2  ;;  %565 = vmatprep.subr.bf16.mxu1 %v749_v7  ;;  %v572_v12 = vpack.c.bf16 %v170_v11, %v169_v10  ;;  %v575_v15 = vpack.c.bf16 %v172_v14, %v171_v13  ;;  %v173_v16 = vld [vmem:[#allocation7 + $0x40] sm:$0xff]  ;;  %v174_v17 = vld [vmem:[#allocation7 + $0x48] sm:$0xff]  ;;  %v175_v19 = vld [vmem:[#allocation7 + $0x50] sm:$0xff]  ;;  %p712_p4 = scmp.ne.s32.totalorder %s432_s14, %s711_s15  ;;  %p717_p6 = scmp.lt.s32.totalorder %s711_s15, %s711_s15 }
  0x4e   :  { %522 = vmatprep.mubr.msk.f32.mxu1 %vm748_vm0, %v747_v0  ;;  %567 = vmatpush3.bf16.msra.mxu1 %v566_v8  ;;  %v578_v18 = vpack.c.bf16 %v174_v17, %v173_v16  ;;  %v176_v20 = vld [vmem:[#allocation7 + $0x58] sm:$0xff]  ;;  %v177_v22 = vld [vmem:[#allocation7 + $0x60] sm:$0xff]  ;;  %v178_v23 = vld [vmem:[#allocation7 + $0x68] sm:$0xff] }
  0x4f   :  { %568 = vmatprep.subr.bf16.mxu1 %v749_v7  ;;  %v581_v21 = vpack.c.bf16 %v176_v20, %v175_v19  ;;  %v584_v24 = vpack.c.bf16 %v178_v23, %v177_v22  ;;  %v179_v25 = vld [vmem:[#allocation7 + $0x70] sm:$0xff]  ;;  %v180_v26 = vld [vmem:[#allocation7 + $0x78] sm:$0xff]  ;;  %v259_v29 = vld [vmem:[#allocation8] sm:$0xff]  ;;  %p718_p7 = por %p717_p6, %p716_p5 }
  0x50   :  { %v587_v27 = vpack.c.bf16 %v180_v26, %v179_v25  ;;  %v275_v28 = vld [vmem:[%s902_s6] sm:$0xff]  ;;  %v260_v30 = vld [vmem:[#allocation8 + $0x8] sm:$0xff]  ;;  %v262_v33 = vld [vmem:[#allocation8 + $0x18] sm:$0xff] }
  0x51   :  { %526 = vmatpush3.msra.mxu0 %v275_v28  ;;  %v590_v31 = vpack.c.bf16 %v260_v30, %v259_v29  ;;  %v261_v32 = vld [vmem:[#allocation8 + $0x10] sm:$0xff]  ;;  %v263_v35 = vld [vmem:[#allocation8 + $0x20] sm:$0xff]  ;;  %v264_v36 = vld [vmem:[#allocation8 + $0x28] sm:$0xff]  ;;  %p719_p8 = pnand %p718_p7, %p712_p4 }
  0x52   :  { %570 = vmatpush3.bf16.msra.mxu1 %v569_v9  ;;  %528 = vmatmul.mubr.msk.f32.vlgmr.msra.gmra.mrb[0].mxu0 %vm90_vm1, %v81_v2  ;;  %v593_v34 = vpack.c.bf16 %v262_v33, %v261_v32  ;;  %v596_v37 = vpack.c.bf16 %v264_v36, %v263_v35  ;;  %v265_v38 = vld [vmem:[#allocation8 + $0x30] sm:$0xff]  ;;  %v266_v39 = vld [vmem:[#allocation8 + $0x38] sm:$0xff]  ;;  %v267_v41 = vld [vmem:[#allocation8 + $0x40] sm:$0xff] }
  0x53   :  { %571 = vmatprep.subr.bf16.mxu1 %v749_v7  ;;  %589 = vmatprep.subr.bf16.mxu0 %v749_v7  ;;  %v599_v40 = vpack.c.bf16 %v266_v39, %v265_v38  ;;  %v268_v42 = vld [vmem:[#allocation8 + $0x48] sm:$0xff]  ;;  %v269_v44 = vld [vmem:[#allocation8 + $0x50] sm:$0xff]  ;;  %v270_v45 = vld [vmem:[#allocation8 + $0x58] sm:$0xff] }
  0x54   :  { %591 = vmatpush3.bf16.msra.mxu0 %v590_v31  ;;  %562 = vmatprep.mubr.msk.f32.mxu0 %vm748_vm0, %v747_v0  ;;  %v602_v43 = vpack.c.bf16 %v268_v42, %v267_v41  ;;  %v605_v46 = vpack.c.bf16 %v270_v45, %v269_v44  ;;  %v271_v47 = vld [vmem:[#allocation8 + $0x60] sm:$0xff]  ;;  %v272_v48 = vld [vmem:[#allocation8 + $0x68] sm:$0xff]  ;;  %v442_v50 = vld [vmem:[%s898_s2] ss:$0 sm:$0xff] }
  0x55   :  { %592 = vmatprep.subr.bf16.mxu0 %v749_v7  ;;  %v608_v49 = vpack.c.bf16 %v272_v48, %v271_v47  ;;  %v273_v55 = vld [vmem:[#allocation8 + $0x70] sm:$0xff]  ;;  %v274_v56 = vld [vmem:[#allocation8 + $0x78] sm:$0xff] }
  0x56   :  { %573 = vmatpush3.bf16.msra.mxu1 %v572_v12  ;;  %v611_v57 = vpack.c.bf16 %v274_v56, %v273_v55  ;;  %v444_v60 = vld [vmem:[%s900_s4] ss:$0 sm:$0xff] }
  0x57   :  { %574 = vmatprep.subr.bf16.mxu1 %v749_v7  ;;  %v446_v2 = vld [vmem:[%s903_s7] ss:$0 sm:$0xff] }
  0x58   :  { %594 = vmatpush3.bf16.msra.mxu0 %v593_v34 }
  0x59   :  { %595 = vmatprep.subr.bf16.mxu0 %v749_v7 }
  0x5a   :  { %576 = vmatpush3.bf16.msra.mxu1 %v575_v15 }
  0x5b   :  { %577 = vmatprep.subr.bf16.mxu1 %v749_v7 }
  0x5c   :  { %597 = vmatpush3.bf16.msra.mxu0 %v596_v37 }
  0x5d   :  { %598 = vmatprep.subr.bf16.mxu0 %v749_v7 }
  0x5e   :  { %579 = vmatpush3.bf16.msra.mxu1 %v578_v18 }
  0x5f   :  { %580 = vmatprep.subr.bf16.mxu1 %v749_v7 }
  0x60   :  { %600 = vmatpush3.bf16.msra.mxu0 %v599_v40 }
  0x61   :  { %601 = vmatprep.subr.bf16.mxu0 %v749_v7 }
  0x62   :  { %582 = vmatpush3.bf16.msra.mxu1 %v581_v21 }
  0x63   :  { %583 = vmatprep.subr.bf16.mxu1 %v749_v7 }
  0x64   :  { %603 = vmatpush3.bf16.msra.mxu0 %v602_v43 }
  0x65   :  { %604 = vmatprep.subr.bf16.mxu0 %v749_v7 }
  0x66   :  { %585 = vmatpush3.bf16.msra.mxu1 %v584_v24 }
  0x67   :  { %586 = vmatprep.subr.bf16.mxu1 %v749_v7 }
  0x68   :  { %606 = vmatpush3.bf16.msra.mxu0 %v605_v46 }
  0x69   :  { %607 = vmatprep.subr.bf16.mxu0 %v749_v7 }
  0x6a   :  { %588 = vmatpush3.bf16.msra.mxu1 %v587_v27 }
  0x6c   :  { %609 = vmatpush3.bf16.msra.mxu0 %v608_v49 }
  0x6d   :  { %610 = vmatprep.subr.bf16.mxu0 %v749_v7 }
  0x70   :  { %612 = vmatpush3.bf16.msra.mxu0 %v611_v57 }
 0x120   :  { %v160_v51 = vpop.f32.mrb[0].mxu1 }
 0x121   :  { %v161_v52 = vadd.f32 %v442_v50, %v160_v51  ;;  %v489_v53 = vpop.f32.mrb[1].mxu1 }
 0x123   :  { %v164_v54 = vmax.f32 %v161_v52, 0.0 }
 0x125   :  { %523 = vmatmul.mubr.f32.vlgmr.msra.gmra.mrb[2].mxu1 %v164_v54  ;;  %v342_v58 = vpop.f32.mrb[0].mxu0 }
 0x126   :  { %v529_v59 = vpop.f32.mrb[1].mxu0 }
 0x1f8   :  { %v254_v61 = vpop.f32.mrb[2].mxu1 }
 0x1f9   :  { %v255_v62 = vadd.f32 %v444_v60, %v254_v61  ;;  %v524_v63 = vpop.f32.mrb[3].mxu1 }
 0x1fb   :  { %v258_v0 = vmax.f32 %v255_v62, 0.0 }
 0x1fd   :  { %563 = vmatmul.mubr.f32.vlgmr.msra.gmra.mrb[2].mxu0 %v258_v0 }
 0x2d0   :  { %v412_v1 = vpop.f32.mrb[2].mxu0 }
 0x2d1   :  { %v413_v3 = vadd.f32 %v412_v1, %v342_v58  ;;  %v564_v4 = vpop.f32.mrb[3].mxu0 }
 0x2d3   :  { %v423_v5 = vadd.f32 %v446_v2, %v413_v3 }
 0x2d5   :  { %424 = vst [vmem:[#allocation10] sm:$0xff] %v423_v5 }
 0x2d6   :  { %722 = shalt.err (!%p719_p8)
}
 0x2d7   :  { %s723_s0 = scalar_lea.hbm %s904_s8, 128 }
 0x2d8   :  { %p724_p9 = scmp.ne.s32.totalorder %s904_s8, %s723_s0  ;;  %p727_p10 = scmp.lt.u32.totalorder %s723_s0, %s904_s8 }
 0x2da   :  { %p729_p11 = pnand %p727_p10, %p724_p9 }
 0x2dc   :  { %732 = shalt.err (!%p729_p11)
}
 0x2dd   :  { %434 = dma.vmem_to_hbm [thread:$0]  %s432_s14, 128, %s904_s8, [#allocation4]  }
 0x2de   :  { %739 = dma.done.wait [#allocation4], 128  }
 0x2df   :  { %740 = vsyncadd [#allocation4], 4294967168 }
 0x2e0   :  { %438 = vsyncpa [#allocation3], 1 }
 0x2e1   :  { %439 = vsyncpa [#allocation6], 1 }
 0x2e2   :  { %440 = vsyncpa [#allocation9], 1 }
 0x2e3   :  { %441 = vsyncpa [#allocation4], 1 }

</bundles_post_ra>
